<compile_context>
chip_gen: v5e
topology: v5e:2x2
jax: 0.10.0
libtpu: 0.0.40
codegen_flags: <defaults>
</compile_context>

<pallas_src>
import jax
import jax.numpy as jnp
from jax.experimental import pallas as pl
from jax.experimental.pallas import tpu as pltpu


def _net_kernel(x_ref, w1_ref, b1_ref, w2_ref, b2_ref, out_ref):
    """One batch tile: out = softmax(relu(x @ W1t + b1) @ W2t + b2, axis=-1)."""
    x = x_ref[...]                                                      # (TB, I) f32
    h = jnp.dot(x, w1_ref[...], preferred_element_type=jnp.float32)    # (TB, H)
    h = jnp.maximum(h + b1_ref[...], 0.0)                              # bias + ReLU
    logits = jnp.dot(h, w2_ref[...], preferred_element_type=jnp.float32)  # (TB, O)
    logits = logits + b2_ref[...]

    # numerically-stable softmax along the last axis
    m = jnp.max(logits, axis=-1, keepdims=True)
    e = jnp.exp(logits - m)
    s = jnp.sum(e, axis=-1, keepdims=True)
    out_ref[...] = (e * pl.reciprocal(s, approx=False)).astype(out_ref.dtype)


def prepare_params(w1, b1, w2, b2):
    """One-time layout prep (PyTorch nn.Linear layout in, kernel layout out).

    w1: (H, I), b1: (H,), w2: (O, H), b2: (O,)
      -> w1t: (I, H), b1: (1, H), w2t: (H, O), b2: (1, O)   all float32
    """
    w1t = jnp.asarray(w1, jnp.float32).T
    b1r = jnp.asarray(b1, jnp.float32).reshape(1, -1)
    w2t = jnp.asarray(w2, jnp.float32).T
    b2r = jnp.asarray(b2, jnp.float32).reshape(1, -1)
    return w1t, b1r, w2t, b2r


def _batch_tile(B):
    """Batch tile size: full batch for B<=128; else min(512, ceil(B/2)) rounded to 8."""
    if B <= 128:
        return B                       # single grid step; block equals full dim
    tb = min(512, -(-B // 2))          # >= 2 grid steps (v7x megacore), <= 512 rows
    return -(-tb // 8) * 8             # multiple of 8 (sublane alignment)


@jax.jit
def net_forward(x, w1t, b1, w2t, b2):
    """x: (B, I) f32; params from prepare_params(). Returns (B, O) probabilities."""
    x = jnp.asarray(x, jnp.float32)
    B, I = x.shape
    H, O = w2t.shape

    TB = _batch_tile(B)
    grid = (pl.cdiv(B, TB),)
    vmem = pltpu.MemorySpace.VMEM

    return pl.pallas_call(
        _net_kernel,
        out_shape=jax.ShapeDtypeStruct((B, O), jnp.float32),
        grid=grid,
        in_specs=[
            pl.BlockSpec((TB, I), lambda i: (i, 0), memory_space=vmem),  # x tile
            pl.BlockSpec((I, H), lambda i: (0, 0), memory_space=vmem),   # W1^T
            pl.BlockSpec((1, H), lambda i: (0, 0), memory_space=vmem),   # b1
            pl.BlockSpec((H, O), lambda i: (0, 0), memory_space=vmem),   # W2^T
            pl.BlockSpec((1, O), lambda i: (0, 0), memory_space=vmem),   # b2
        ],
        out_specs=pl.BlockSpec((TB, O), lambda i: (i, 0), memory_space=vmem),
        compiler_params=pltpu.CompilerParams(
            dimension_semantics=("parallel",),
            vmem_limit_bytes=32 * 1024 * 1024,
        ),
    )(x, w1t, b1, w2t, b2)


def init_params(key, input_size, hidden_size, output_size):
    """Deterministic PyTorch-style nn.Linear init: U(-1/sqrt(fan_in), 1/sqrt(fan_in))."""
    k1, k2, k3, k4 = jax.random.split(key, 4)
    lim1 = 1.0 / jnp.sqrt(jnp.float32(input_size))
    lim2 = 1.0 / jnp.sqrt(jnp.float32(hidden_size))
    w1 = jax.random.uniform(k1, (hidden_size, input_size), jnp.float32, -lim1, lim1)
    b1 = jax.random.uniform(k2, (hidden_size,), jnp.float32, -lim1, lim1)
    w2 = jax.random.uniform(k3, (output_size, hidden_size), jnp.float32, -lim2, lim2)
    b2 = jax.random.uniform(k4, (output_size,), jnp.float32, -lim2, lim2)
    return w1, b1, w2, b2


if __name__ == "__main__":
    # Small shapes consistent with a CartPole-style REINFORCE policy net.
    batch, input_size, hidden_size, output_size = 8, 4, 32, 2

    key = jax.random.PRNGKey(0)
    kx, kp = jax.random.split(key)
    x = jax.random.normal(kx, (batch, input_size), jnp.float32)
    w1, b1, w2, b2 = init_params(kp, input_size, hidden_size, output_size)

    # One-time parameter preparation (hoisted out of the per-call path).
    params = prepare_params(w1, b1, w2, b2)
    params = jax.block_until_ready(params)

    prob = net_forward(x, *params)
    prob = jax.block_until_ready(prob)

    # sanity: probabilities sum to ~1 along the last axis
    assert prob.shape == (batch, output_size)
    assert bool(jnp.allclose(jnp.sum(prob, axis=-1), 1.0, atol=1e-5))

    # cross-check against a pure-JAX f32 reference of the same math
    h_ref = jnp.maximum(x @ w1.T + b1, 0.0)
    ref = jax.nn.softmax(h_ref @ w2.T + b2, axis=-1)
    assert bool(jnp.allclose(prob, ref, atol=1e-3)), (prob, ref)

    print("KERNEL_OK")
</pallas_src>

<mosaic_0001>
module attributes {stable_mosaic.version = 11 : i64} {
  func.func @_net_kernel(%arg0: i32, %arg1: memref<8x4xf32, #tpu.memory_space<vmem>>, %arg2: memref<4x32xf32, #tpu.memory_space<vmem>>, %arg3: memref<1x32xf32, #tpu.memory_space<vmem>>, %arg4: memref<32x2xf32, #tpu.memory_space<vmem>>, %arg5: memref<1x2xf32, #tpu.memory_space<vmem>>, %arg6: memref<8x2xf32, #tpu.memory_space<vmem>>) attributes {dimension_semantics = [#tpu.dimension_semantics<parallel>], iteration_bounds = array<i64: 1>, scalar_prefetch = 0 : i64, scratch_operands = 0 : i64, tpu.core_type = #tpu.core_type<tc>, window_params = [{transform_indices = @transform_0, window_bounds = array<i64: 8, 4>}, {pipeline_mode = #tpu.pipeline_mode<synchronous>, transform_indices = @transform_1, window_bounds = array<i64: 4, 32>}, {pipeline_mode = #tpu.pipeline_mode<synchronous>, transform_indices = @transform_2, window_bounds = array<i64: 1, 32>}, {pipeline_mode = #tpu.pipeline_mode<synchronous>, transform_indices = @transform_3, window_bounds = array<i64: 32, 2>}, {pipeline_mode = #tpu.pipeline_mode<synchronous>, transform_indices = @transform_4, window_bounds = array<i64: 1, 2>}, {transform_indices = @transform_5, window_bounds = array<i64: 8, 2>}]} {
    %c0 = arith.constant 0 : index
    %c0_0 = arith.constant 0 : index
    %0 = vector.load %arg1[%c0, %c0_0] : memref<8x4xf32, #tpu.memory_space<vmem>>, vector<8x4xf32>
    %c0_1 = arith.constant 0 : index
    %c0_2 = arith.constant 0 : index
    %1 = vector.load %arg2[%c0_1, %c0_2] : memref<4x32xf32, #tpu.memory_space<vmem>>, vector<4x32xf32>
    %cst = arith.constant dense<0.000000e+00> : vector<8x32xf32>
    %2 = tpu.matmul %0, %1, %cst {dimension_numbers = #tpu.dot_dimension_numbers<[1], [0], [0], [1], [0, 0, 1, 1], [], []>} : vector<8x4xf32>, vector<4x32xf32>, vector<8x32xf32> -> vector<8x32xf32>
    %c0_3 = arith.constant 0 : index
    %c0_4 = arith.constant 0 : index
    %3 = vector.load %arg3[%c0_3, %c0_4] : memref<1x32xf32, #tpu.memory_space<vmem>>, vector<1x32xf32>
    %4 = vector.broadcast %3 : vector<1x32xf32> to vector<8x32xf32>
    %5 = arith.addf %2, %4 : vector<8x32xf32>
    %cst_5 = arith.constant 0.000000e+00 : f32
    %6 = vector.broadcast %cst_5 : f32 to vector<8x32xf32>
    %7 = arith.maximumf %5, %6 : vector<8x32xf32>
    %c0_6 = arith.constant 0 : index
    %c0_7 = arith.constant 0 : index
    %8 = vector.load %arg4[%c0_6, %c0_7] : memref<32x2xf32, #tpu.memory_space<vmem>>, vector<32x2xf32>
    %cst_8 = arith.constant dense<0.000000e+00> : vector<8x2xf32>
    %9 = tpu.matmul %7, %8, %cst_8 {dimension_numbers = #tpu.dot_dimension_numbers<[1], [0], [0], [1], [0, 0, 1, 1], [], []>} : vector<8x32xf32>, vector<32x2xf32>, vector<8x2xf32> -> vector<8x2xf32>
    %c0_9 = arith.constant 0 : index
    %c0_10 = arith.constant 0 : index
    %10 = vector.load %arg5[%c0_9, %c0_10] : memref<1x2xf32, #tpu.memory_space<vmem>>, vector<1x2xf32>
    %11 = vector.broadcast %10 : vector<1x2xf32> to vector<8x2xf32>
    %12 = arith.addf %9, %11 : vector<8x2xf32>
    %cst_11 = arith.constant dense<0xFF800000> : vector<8xf32>
    %13 = vector.multi_reduction <maximumf>, %12, %cst_11 [1] : vector<8x2xf32> to vector<8xf32>
    %14 = vector.shape_cast %13 : vector<8xf32> to vector<8x1xf32>
    %15 = vector.broadcast %14 : vector<8x1xf32> to vector<8x2xf32>
    %16 = arith.subf %12, %15 : vector<8x2xf32>
    %17 = math.exp %16 : vector<8x2xf32>
    %cst_12 = arith.constant dense<0.000000e+00> : vector<8xf32>
    %18 = vector.multi_reduction <add>, %17, %cst_12 [1] : vector<8x2xf32> to vector<8xf32>
    %19 = vector.shape_cast %18 : vector<8xf32> to vector<8x1xf32>
    %20 = tpu.reciprocal %19 : vector<8x1xf32> -> vector<8x1xf32>
    %21 = vector.broadcast %20 : vector<8x1xf32> to vector<8x2xf32>
    %22 = arith.mulf %17, %21 : vector<8x2xf32>
    %c0_13 = arith.constant 0 : index
    %c0_14 = arith.constant 0 : index
    %23 = vector.load %arg6[%c0_13, %c0_14] : memref<8x2xf32, #tpu.memory_space<vmem>>, vector<8x2xf32>
    tpu.vector_store %arg6[%c0_13, %c0_14], %22 {strides = array<i32>} : memref<8x2xf32, #tpu.memory_space<vmem>>, vector<8x2xf32>,
    return
  }
  func.func @transform_0(%arg0: i32) -> (i32, i32) {
    %c0_i32 = arith.constant 0 : i32
    %c0_i32_0 = arith.constant 0 : i32
    return %arg0, %c0_i32 : i32, i32
  }
  func.func @transform_1(%arg0: i32) -> (i32, i32) {
    %c0_i32 = arith.constant 0 : i32
    %c0_i32_0 = arith.constant 0 : i32
    %c0_i32_1 = arith.constant 0 : i32
    return %c0_i32, %c0_i32_0 : i32, i32
  }
  func.func @transform_2(%arg0: i32) -> (i32, i32) {
    %c0_i32 = arith.constant 0 : i32
    %c0_i32_0 = arith.constant 0 : i32
    %c0_i32_1 = arith.constant 0 : i32
    return %c0_i32, %c0_i32_0 : i32, i32
  }
  func.func @transform_3(%arg0: i32) -> (i32, i32) {
    %c0_i32 = arith.constant 0 : i32
    %c0_i32_0 = arith.constant 0 : i32
    %c0_i32_1 = arith.constant 0 : i32
    return %c0_i32, %c0_i32_0 : i32, i32
  }
  func.func @transform_4(%arg0: i32) -> (i32, i32) {
    %c0_i32 = arith.constant 0 : i32
    %c0_i32_0 = arith.constant 0 : i32
    %c0_i32_1 = arith.constant 0 : i32
    return %c0_i32, %c0_i32_0 : i32, i32
  }
  func.func @transform_5(%arg0: i32) -> (i32, i32) {
    %c0_i32 = arith.constant 0 : i32
    %c0_i32_0 = arith.constant 0 : i32
    return %arg0, %c0_i32 : i32, i32
  }
}

</mosaic_0001>

<bundles_post_ra>
// kernel: net_forward.1
= control target key start
LH: loop header
LB: loop body
LE: loop exit
PB: predicated region body
PF: predicated region fallthrough
CT: control target
= control target key end

     0   :  { %vm30_vm0 = vcmask 1043456   ;;  %vm26_vm1 = vcmask 31744   ;;  %vm63_vm2 = vcmask 261120   ;;  %vm87_vm3 = vcmask 15360   ;;  %s186_s1 = inlined_call_operand.vmem [shape: f32[4,32], index: 1, kind: input, shape index: {}]   ;;  %s187_s0 = inlined_call_operand.vmem [shape: f32[8,4], index: 0, kind: input, shape index: {}]   ;;  %s188_s3 = inlined_call_operand.vmem [shape: f32[32,2], index: 3, kind: input, shape index: {}]   ;;  %s189_s2 = inlined_call_operand.vmem [shape: f32[1,32], index: 2, kind: input, shape index: {}]   ;;  %s190_s4 = inlined_call_operand.vmem [shape: f32[1,2], index: 4, kind: input, shape index: {}]   ;;  %s191_s5 = inlined_call_operand.vmem [shape: f32[8,2], index: 5, kind: output, shape index: {}]  }
   0x1   :  { %v21_v0 = vld [vmem:[%s186_s1] sm:$0xf]  ;;  %v58_v2 = vld [vmem:[%s188_s3 + $0x18] sm:$0xff]  ;;  %v57_v3 = vld [vmem:[%s188_s3 + $0x10] sm:$0xff] }
   0x2   :  { %v20_v1 = vld [vmem:[%s187_s0] sm:$0xff]  ;;  %117 = vmatpush.msk.msra.mxu0 %vm30_vm0, %v21_v0  ;;  %79 = vmatpush.msra.mxu1 %v58_v2  ;;  %v56_v4 = vld [vmem:[%s188_s3 + $0x8] sm:$0xff] }
   0x3   :  { %118 = vmatmul.msk.f32.vlgmr.msra.gmra.mxu0 %vm26_vm1, %v20_v1  ;;  %v55_v5 = vld [vmem:[%s188_s3] sm:$0xff] }
   0x4   :  { %80 = vmatpush.msra.mxu1 %v57_v3  ;;  %v120_v6 = vld [vmem:[%s189_s2] ss:$0 sm:$0xff] }
   0x5   :  { %v121_v10 = vld [vmem:[%s190_s4] ss:$0 sm:$0xff] }
   0x6   :  { %81 = vmatpush.msra.mxu1 %v56_v4 }
   0x8   :  { %82 = vmatpush.msra.mxu1 %v55_v5 }
  0x80   :  { %v51_v7 = vpop.f32.mrf.mxu0 }
  0x81   :  { %v52_v8 = vadd.f32 %v120_v6, %v51_v7 }
  0x83   :  { %v54_v9 = vmax.f32 %v52_v8, 0.0 }
  0x85   :  { %119 = vmatmul.msk.f32.vlgmr.msra.gmra.mxu1 %vm63_vm2, %v54_v9 }
 0x102   :  { %v84_v11 = vpop.f32.mrf.mxu1 }
 0x103   :  { %v85_v12 = vadd.f32 %v121_v10, %v84_v11 }
 0x105   :  { %v88_v13 = vsel %vm87_vm3, %v85_v12, -inf }
 0x106   :  { %89 = vmax.xlane.f32.xlu0 %v88_v13 }
 0x179   :  { %v90_v14 = vpop.xlane.xlu0 %89 }
 0x17a   :  { %v91_v15 = vsub.f32 %v85_v12, %v90_v14 }
 0x17c   :  { %v92_v16 = vmul.f32 1.442695, %v91_v15 }
 0x17e   :  { %122 = vpow2.f32 %v92_v16 }
 0x184   :  { %v123_v17 = vpop.eup %122 }
 0x185   :  { %v94_v18 = vsel %vm87_vm3, %v123_v17, 0.0 }
 0x186   :  { %95 = vadd.xlane.f32.xlu0 %v94_v18 }
 0x1f9   :  { %v96_v19 = vpop.xlane.xlu0 %95 }
 0x1fa   :  { %124 = vrcp.f32 %v96_v19  ;;  %v108_v23 = vand.u32 2147483648, %v96_v19  ;;  %v106_v25 = vand.u32 2147483647, %v96_v19  ;;  %vm102_vm5 = vweird.f32 %v96_v19 }
 0x1fc   :  { %v109_v27 = vor.u32 1.1754944e-38, %v108_v23  ;;  %vm107_vm7 = vcmp.eq.f32.partialorder %v106_v25, 8.507059e+37 }
 0x200   :  { %v125_v20 = vpop.eup %124 }
 0x201   :  { %v98_v21 = vmul.f32 %v125_v20, %v96_v19  ;;  %vm103_vm4 = vweird.f32 %v125_v20 }
 0x202   :  { %vm104_vm6 = vmor %vm102_vm5, %vm103_vm4 }
 0x203   :  { %v99_v22 = vsub.f32 1.0, %v98_v21 }
 0x205   :  { %v100_v24 = vmul.f32 %v125_v20, %v99_v22 }
 0x207   :  { %v101_v26 = vadd.f32 %v125_v20, %v100_v24 }
 0x209   :  { %v105_v28 = vsel %vm104_vm6, %v125_v20, %v101_v26 }
 0x20a   :  { %v110_v29 = vsel %vm107_vm7, %v109_v27, %v105_v28 }
 0x20b   :  { %v111_v30 = vmul.f32 %v123_v17, %v110_v29 }
 0x20d   :  { %112 = vst.msk [vmem:[%s191_s5] sm:$0xff] %vm87_vm3, %v111_v30 }

</bundles_post_ra>
